<compile_context>
chip_gen: v7x
topology: tpu7x:2x2x1
jax: 0.10.0
libtpu: 0.0.40
codegen_flags: <defaults>
</compile_context>

<pallas_src>
import functools

import jax
import jax.numpy as jnp
from jax.experimental import pallas as pl
from jax.experimental.pallas import tpu as pltpu


# ----------------------------------------------------------------------------
# Kernels
# ----------------------------------------------------------------------------
def _fused_kernel(x_ref, o_ref, *, hw, c_gate, eps):
    """Single-pass GCT: pool + stats + gate + scale on one resident block.
    Refs: x_ref/o_ref: (NB, C, HW)."""
    x = x_ref[...].astype(jnp.float32)                        # (NB, C, HW)
    y = jnp.sum(x, axis=-1, keepdims=True) * (1.0 / hw)       # (NB, C, 1) channel means
    mean = jnp.mean(y, axis=1, keepdims=True)                 # (NB, 1, 1)
    mean_x2 = jnp.mean(y * y, axis=1, keepdims=True)
    var = jnp.maximum(mean_x2 - mean * mean, 0.0)             # clamp cancellation
    y_norm = (y - mean) * jax.lax.rsqrt(var + eps)
    gate = jnp.exp(-(y_norm * y_norm) * (0.5 * c_gate))       # (NB, C, 1)
    o_ref[...] = (x * gate).astype(o_ref.dtype)               # f32 multiply, one cast


def _pool_gate_kernel(x_ref, gate_ref, acc_ref, *, hw, c_gate, eps):
    """Pass 1 of the two-pass fallback.
      x_ref:    (1, C, Thw)  spatial tile of one batch element
      gate_ref: (1, C, 1)    per-(batch, channel) gate (f32)
      acc_ref:  (1, C, 1)    f32 running spatial sum (scratch)
    """
    j = pl.program_id(1)
    last = pl.num_programs(1) - 1

    @pl.when(j == 0)
    def _():
        acc_ref[...] = jnp.zeros_like(acc_ref)

    thw = x_ref.shape[-1]
    if hw % thw != 0:
        # Ragged tail: mask only on the last tile; plain sum everywhere else.
        @pl.when(j != last)
        def _():
            acc_ref[...] += jnp.sum(x_ref[...].astype(jnp.float32),
                                    axis=-1, keepdims=True)

        @pl.when(j == last)
        def _():
            xb = x_ref[...].astype(jnp.float32)
            col = jax.lax.broadcasted_iota(jnp.int32, x_ref.shape, 2) + j * thw
            xb = jnp.where(col < hw, xb, 0.0)
            acc_ref[...] += jnp.sum(xb, axis=-1, keepdims=True)
    else:
        acc_ref[...] += jnp.sum(x_ref[...].astype(jnp.float32),
                                axis=-1, keepdims=True)

    @pl.when(j == last)
    def _():
        y = acc_ref[...] * (1.0 / hw)                          # per-channel means
        mean = jnp.mean(y, axis=1, keepdims=True)
        mean_x2 = jnp.mean(y * y, axis=1, keepdims=True)
        var = jnp.maximum(mean_x2 - mean * mean, 0.0)
        y_norm = (y - mean) * jax.lax.rsqrt(var + eps)
        gate_ref[...] = jnp.exp(-(y_norm * y_norm) * (0.5 * c_gate))


def _scale_kernel(x_ref, gate_ref, o_ref):
    """Pass 2: (1, C, Thw) * (1, C, 1) -> lane-broadcast gate, f32 multiply."""
    o_ref[...] = (x_ref[...].astype(jnp.float32) * gate_ref[...]).astype(o_ref.dtype)


# ----------------------------------------------------------------------------
# Tiling / VMEM sizing helpers
# ----------------------------------------------------------------------------
def _pick_hw_tile(hw, c, itemsize, max_tile_bytes):
    """Largest spatial (lane-dim) tile: full H*W when it fits, else a multiple
    of 128 sized to ~max_tile_bytes per buffer."""
    if c * hw * itemsize <= max_tile_bytes or hw <= 128:
        return int(hw)
    t = (max_tile_bytes // (c * itemsize)) // 128 * 128
    return int(max(128, min(t, hw)))


def _vmem_limit_bytes(block_bytes, block_elems):
    """Double-buffered in + out plus an f32 working copy plus slack, floored at
    16 MiB and capped at 48 MiB (v7x has only 64 MiB physical VMEM)."""
    need = 4 * block_bytes + 2 * block_elems * 4 + (2 << 20)
    return int(min(48 << 20, max(need, 16 << 20)))


# ----------------------------------------------------------------------------
# Driver
# ----------------------------------------------------------------------------
@functools.partial(jax.jit, static_argnames=("c_gate", "eps", "max_tile_bytes"))
def gct_forward(x_nchw, *, c_gate=2.0, eps=1e-5, max_tile_bytes=3 * 1024 * 1024):
    """GCT forward.  x_nchw: [N, C, H, W] -> [N, C, H, W]."""
    n, c, h, w = x_nchw.shape
    hw = h * w
    x3 = x_nchw.reshape(n, c, hw)        # free view: H, W are contiguous
    itemsize = jnp.dtype(x_nchw.dtype).itemsize
    slab = c * hw * itemsize             # one batch element

    # ---------------- Fused single-pass fast path (2x|x| HBM traffic) -------
    if slab <= max_tile_bytes:
        nb = int(max(1, min(n, max_tile_bytes // slab)))       # batch-block
        block_bytes = nb * slab
        block_elems = nb * c * hw
        y3 = pl.pallas_call(
            functools.partial(_fused_kernel, hw=hw, c_gate=float(c_gate),
                              eps=float(eps)),
            out_shape=jax.ShapeDtypeStruct((n, c, hw), x_nchw.dtype),
            grid_spec=pltpu.PrefetchScalarGridSpec(
                num_scalar_prefetch=0,
                grid=(pl.cdiv(n, nb),),
                in_specs=[pl.BlockSpec((nb, c, hw), lambda b: (b, 0, 0))],
                out_specs=pl.BlockSpec((nb, c, hw), lambda b: (b, 0, 0)),
            ),
            compiler_params=pltpu.CompilerParams(
                dimension_semantics=("parallel",),
                vmem_limit_bytes=_vmem_limit_bytes(block_bytes, block_elems)),
        )(x3)
        return y3.reshape(n, c, h, w)

    # ---------------- Two-pass fallback (3x|x| HBM traffic) -----------------
    thw = _pick_hw_tile(hw, c, itemsize, max_tile_bytes)
    n_hw = pl.cdiv(hw, thw)
    block_bytes = c * thw * itemsize
    block_elems = c * thw
    vmem_limit = _vmem_limit_bytes(block_bytes, block_elems)

    # Pass 1: global avg-pool + channel stats + Gaussian gate, fused.
    gate = pl.pallas_call(
        functools.partial(_pool_gate_kernel, hw=hw, c_gate=float(c_gate),
                          eps=float(eps)),
        out_shape=jax.ShapeDtypeStruct((n, c, 1), jnp.float32),
        grid_spec=pltpu.PrefetchScalarGridSpec(
            num_scalar_prefetch=0,
            grid=(n, n_hw),
            in_specs=[pl.BlockSpec((1, c, thw), lambda b, j: (b, 0, j))],
            out_specs=pl.BlockSpec((1, c, 1), lambda b, j: (b, 0, 0)),
            scratch_shapes=[pltpu.VMEM((1, c, 1), jnp.float32)],
        ),
        compiler_params=pltpu.CompilerParams(
            dimension_semantics=("parallel", "arbitrary"),
            vmem_limit_bytes=vmem_limit),
    )(x3)

    # Pass 2: out = x * gate (gate broadcast over the flattened spatial lanes).
    y3 = pl.pallas_call(
        _scale_kernel,
        out_shape=jax.ShapeDtypeStruct((n, c, hw), x_nchw.dtype),
        grid_spec=pltpu.PrefetchScalarGridSpec(
            num_scalar_prefetch=0,
            grid=(n, n_hw),
            in_specs=[
                pl.BlockSpec((1, c, thw), lambda b, j: (b, 0, j)),
                pl.BlockSpec((1, c, 1), lambda b, j: (b, 0, 0)),
            ],
            out_specs=pl.BlockSpec((1, c, thw), lambda b, j: (b, 0, j)),
        ),
        compiler_params=pltpu.CompilerParams(
            dimension_semantics=("parallel", "parallel"),
            vmem_limit_bytes=vmem_limit),
    )(x3, gate)

    return y3.reshape(n, c, h, w)


# ----------------------------------------------------------------------------
# Reference + test
# ----------------------------------------------------------------------------
def _reference(x, c_gate=2.0, eps=1e-5):
    """Pure-JAX mirror of the PyTorch GCT forward."""
    y = jnp.mean(x, axis=(2, 3), keepdims=True)           # [N, C, 1, 1]
    mean = jnp.mean(y, axis=1, keepdims=True)
    mean_x2 = jnp.mean(y * y, axis=1, keepdims=True)
    var = mean_x2 - mean ** 2
    y_norm = (y - mean) / jnp.sqrt(var + eps)
    gate = jnp.exp(-(y_norm ** 2 / 2.0 * c_gate))
    return x * gate


if __name__ == "__main__":
    key = jax.random.PRNGKey(0)

    # Primary shape from the module: batch=2, channels=4, spatial=16.
    n, c, spatial = 2, 4, 16
    x = jax.random.normal(key, (n, c, spatial, spatial), jnp.float32)

    # 1) Fused single-pass fast path (default tile budget).
    y = jax.block_until_ready(gct_forward(x))
    y_ref = _reference(x)
    assert y.shape == x.shape
    assert jnp.allclose(y, y_ref, atol=1e-5, rtol=1e-5), \
        float(jnp.max(jnp.abs(y - y_ref)))

    # 2) Two-pass fallback (force a tiny tile budget so slab > budget),
    #    including a ragged spatial tail (18*18 = 324 is not a multiple of 128).
    x2 = jax.random.normal(jax.random.PRNGKey(1), (2, 4, 18, 18), jnp.float32)
    y2 = jax.block_until_ready(gct_forward(x2, max_tile_bytes=2048))
    y2_ref = _reference(x2)
    assert y2.shape == x2.shape
    assert jnp.allclose(y2, y2_ref, atol=1e-5, rtol=1e-5), \
        float(jnp.max(jnp.abs(y2 - y2_ref)))

    print("KERNEL_OK")
</pallas_src>

<mosaic_0001>
module attributes {stable_mosaic.version = 11 : i64} {
  func.func @_fused_kernel(%arg0: i32, %arg1: memref<2x4x256xf32, #tpu.memory_space<vmem>>, %arg2: memref<2x4x256xf32, #tpu.memory_space<vmem>>) attributes {dimension_semantics = [#tpu.dimension_semantics<parallel>], iteration_bounds = array<i64: 1>, scalar_prefetch = 0 : i64, scratch_operands = 0 : i64, tpu.core_type = #tpu.core_type<tc>, window_params = [{transform_indices = @transform_0, window_bounds = array<i64: 2, 4, 256>}, {transform_indices = @transform_1, window_bounds = array<i64: 2, 4, 256>}]} {
    %c0 = arith.constant 0 : index
    %c0_0 = arith.constant 0 : index
    %c0_1 = arith.constant 0 : index
    %0 = vector.load %arg1[%c0, %c0_0, %c0_1] : memref<2x4x256xf32, #tpu.memory_space<vmem>>, vector<2x4x256xf32>
    %cst = arith.constant dense<0.000000e+00> : vector<2x4xf32>
    %1 = vector.multi_reduction <add>, %0, %cst [2] : vector<2x4x256xf32> to vector<2x4xf32>
    %2 = vector.shape_cast %1 : vector<2x4xf32> to vector<2x4x1xf32>
    %cst_2 = arith.constant 3.906250e-03 : f32
    %3 = vector.broadcast %cst_2 : f32 to vector<2x4x1xf32>
    %4 = arith.mulf %2, %3 : vector<2x4x1xf32>
    %cst_3 = arith.constant dense<0.000000e+00> : vector<2x1xf32>
    %5 = vector.multi_reduction <add>, %4, %cst_3 [1] : vector<2x4x1xf32> to vector<2x1xf32>
    %6 = vector.shape_cast %5 : vector<2x1xf32> to vector<2x1x1xf32>
    %cst_4 = arith.constant 4.000000e+00 : f32
    %7 = vector.broadcast %cst_4 : f32 to vector<2x1x1xf32>
    %8 = arith.divf %6, %7 : vector<2x1x1xf32>
    %9 = arith.mulf %4, %4 : vector<2x4x1xf32>
    %cst_5 = arith.constant dense<0.000000e+00> : vector<2x1xf32>
    %10 = vector.multi_reduction <add>, %9, %cst_5 [1] : vector<2x4x1xf32> to vector<2x1xf32>
    %11 = vector.shape_cast %10 : vector<2x1xf32> to vector<2x1x1xf32>
    %cst_6 = arith.constant 4.000000e+00 : f32
    %12 = vector.broadcast %cst_6 : f32 to vector<2x1x1xf32>
    %13 = arith.divf %11, %12 : vector<2x1x1xf32>
    %14 = arith.mulf %8, %8 : vector<2x1x1xf32>
    %15 = arith.subf %13, %14 : vector<2x1x1xf32>
    %cst_7 = arith.constant 0.000000e+00 : f32
    %16 = vector.broadcast %cst_7 : f32 to vector<2x1x1xf32>
    %17 = arith.maximumf %15, %16 : vector<2x1x1xf32>
    %18 = vector.broadcast %8 : vector<2x1x1xf32> to vector<2x4x1xf32>
    %19 = arith.subf %4, %18 : vector<2x4x1xf32>
    %cst_8 = arith.constant 9.99999974E-6 : f32
    %20 = vector.broadcast %cst_8 : f32 to vector<2x1x1xf32>
    %21 = arith.addf %17, %20 : vector<2x1x1xf32>
    %22 = math.rsqrt %21 : vector<2x1x1xf32>
    %23 = vector.broadcast %22 : vector<2x1x1xf32> to vector<2x4x1xf32>
    %24 = arith.mulf %19, %23 : vector<2x4x1xf32>
    %25 = arith.mulf %24, %24 : vector<2x4x1xf32>
    %cst_9 = arith.constant 0.000000e+00 : f32
    %26 = vector.broadcast %cst_9 : f32 to vector<2x4x1xf32>
    %27 = arith.subf %26, %25 : vector<2x4x1xf32>
    %cst_10 = arith.constant 1.000000e+00 : f32
    %28 = vector.broadcast %cst_10 : f32 to vector<2x4x1xf32>
    %29 = arith.mulf %27, %28 : vector<2x4x1xf32>
    %30 = math.exp %29 : vector<2x4x1xf32>
    %31 = vector.broadcast %30 : vector<2x4x1xf32> to vector<2x4x256xf32>
    %32 = arith.mulf %0, %31 : vector<2x4x256xf32>
    %c0_11 = arith.constant 0 : index
    %c0_12 = arith.constant 0 : index
    %c0_13 = arith.constant 0 : index
    %33 = vector.load %arg2[%c0_11, %c0_12, %c0_13] : memref<2x4x256xf32, #tpu.memory_space<vmem>>, vector<2x4x256xf32>
    tpu.vector_store %arg2[%c0_11, %c0_12, %c0_13], %32 {strides = array<i32>} : memref<2x4x256xf32, #tpu.memory_space<vmem>>, vector<2x4x256xf32>,
    return
  }
  func.func @transform_0(%arg0: i32) -> (i32, i32, i32) {
    %c0_i32 = arith.constant 0 : i32
    %c0_i32_0 = arith.constant 0 : i32
    %c0_i32_1 = arith.constant 0 : i32
    return %arg0, %c0_i32, %c0_i32_0 : i32, i32, i32
  }
  func.func @transform_1(%arg0: i32) -> (i32, i32, i32) {
    %c0_i32 = arith.constant 0 : i32
    %c0_i32_0 = arith.constant 0 : i32
    %c0_i32_1 = arith.constant 0 : i32
    return %arg0, %c0_i32, %c0_i32_0 : i32, i32, i32
  }
}

</mosaic_0001>

<bundles_post_ra>
// kernel: gct_forward.1
= control target key start
LH: loop header
LB: loop body
LE: loop exit
PB: predicated region body
PF: predicated region fallthrough
CT: control target
= control target key end

     0   :  { %vm16_vm0 = vcmask 1043456   ;;  %s166_s0 = inlined_call_operand.vmem [shape: f32[2,4,256], index: 0, kind: input, shape index: {}]   ;;  %s167_s1 = inlined_call_operand.vmem [shape: f32[2,4,256], index: 1, kind: output, shape index: {}]  }
   0x1   :  { %v137_v0 = vld [vmem:[%s166_s0] sm:$0xff]  ;;  %v142_v1 = vld [vmem:[%s166_s0 + $0x8] sm:$0xff] }
   0x2   :  { %v12_v2 = vcombine.high %v137_v0, %v137_v0  ;;  %v17_v3 = vsel %vm16_vm0, %v137_v0, 0.0  ;;  %v13_v4 = vcombine.high %v142_v1, %v142_v1  ;;  %v22_v6 = vsel %vm16_vm0, %v142_v1, 0.0 }
   0x4   :  { %v18_v5 = vsel %vm16_vm0, %v12_v2, 0.0  ;;  %v23_v7 = vsel %vm16_vm0, %v13_v4, 0.0 }
   0x5   :  { %v19_v8 = vadd.f32 %v18_v5, %v17_v3  ;;  %v24_v9 = vadd.f32 %v23_v7, %v22_v6  ;;  %v123_v3 = vmov 839922192   ;;  %v91_v5 = vlaneseq }
   0x6   :  { %v89_v4 = vunpack.c.l.s4 %v123_v3 }
   0x7   :  { %20 = vadd.xlane.f32.xlu0 %v19_v8 }
   0x8   :  { %v90_v8 = vunpack.c.0.s8 %v89_v4 }
   0xb   :  { %25 = vadd.xlane.f32.xlu0 %v24_v9  ;;  %v92_v9 = vshrl.u32 %v91_v5, 7 }
  0x94   :  { %v21_v10 = vpop.xlane.xlu0 %20 }
  0x95   :  { %v27_v11 = vmul.f32 0.00390625, %v21_v10 }
  0x97   :  { %v29_v12 = vsel %vm16_vm0, %v27_v11, 0.0  ;;  %v46_v13 = vmul.f32 %v27_v11, %v27_v11 }
  0x98   :  { %v30_v14 = vrot.slane %v29_v12, 4  ;;  %v26_v15 = vpop.xlane.xlu0 %25 }
  0x99   :  { %v48_v16 = vsel %vm16_vm0, %v46_v13, 0.0  ;;  %v28_v17 = vmul.f32 0.00390625, %v26_v15 }
  0x9a   :  { %v31_v18 = vadd.f32 %v30_v14, %v29_v12  ;;  %v49_v19 = vrot.slane %v48_v16, 4  ;;  %v93_v12 = vsub.s32 %v90_v8, %v92_v9 }
  0x9b   :  { %v36_v20 = vsel %vm16_vm0, %v28_v17, 0.0  ;;  %v47_v21 = vmul.f32 %v28_v17, %v28_v17 }
  0x9c   :  { %v32_v22 = vrot.slane %v31_v18, 2  ;;  %v50_v23 = vadd.f32 %v49_v19, %v48_v16  ;;  %v37_v24 = vrot.slane %v36_v20, 4 }
  0x9d   :  { %v55_v25 = vsel %vm16_vm0, %v47_v21, 0.0 }
  0x9e   :  { %v33_v26 = vadd.f32 %v32_v22, %v31_v18  ;;  %v51_v27 = vrot.slane %v50_v23, 2  ;;  %v38_v28 = vadd.f32 %v37_v24, %v36_v20  ;;  %v56_v29 = vrot.slane %v55_v25, 4 }
  0xa0   :  { %v34_v30 = vrot.slane %v33_v26, 1  ;;  %v52_v31 = vadd.f32 %v51_v27, %v50_v23  ;;  %v39_v32 = vrot.slane %v38_v28, 2  ;;  %v57_v33 = vadd.f32 %v56_v29, %v55_v25 }
  0xa2   :  { %v35_v34 = vadd.f32 %v34_v30, %v33_v26  ;;  %v53_v35 = vrot.slane %v52_v31, 1  ;;  %v40_v36 = vadd.f32 %v39_v32, %v38_v28  ;;  %v58_v37 = vrot.slane %v57_v33, 2 }
  0xa4   :  { %v44_v38 = vmul.f32 0.25, %v35_v34  ;;  %v54_v39 = vadd.f32 %v53_v35, %v52_v31  ;;  %v41_v40 = vrot.slane %v40_v36, 1  ;;  %v59_v41 = vadd.f32 %v58_v37, %v57_v33 }
  0xa6   :  { %v62_v42 = vmul.f32 0.25, %v54_v39  ;;  %v64_v43 = vmul.f32 %v44_v38, %v44_v38  ;;  %v42_v44 = vadd.f32 %v41_v40, %v40_v36  ;;  %v60_v45 = vrot.slane %v59_v41, 1 }
  0xa7   :  { %v70_v56 = vsub.f32 %v27_v11, %v44_v38 }
  0xa8   :  { %v66_v46 = vsub.f32 %v62_v42, %v64_v43  ;;  %v45_v47 = vmul.f32 0.25, %v42_v44  ;;  %v61_v48 = vadd.f32 %v60_v45, %v59_v41 }
  0xaa   :  { %v68_v49 = vmax.f32 %v66_v46, 0.0  ;;  %v65_v50 = vmul.f32 %v45_v47, %v45_v47  ;;  %v63_v51 = vmul.f32 0.25, %v61_v48  ;;  %v71_v60 = vsub.f32 %v28_v17, %v45_v47 }
  0xac   :  { %v72_v52 = vadd.f32 1e-05, %v68_v49  ;;  %v67_v53 = vsub.f32 %v63_v51, %v65_v50 }
  0xae   :  { %115 = vrsqrt.f32 %v72_v52  ;;  %v69_v54 = vmax.f32 %v67_v53, 0.0 }
  0xb0   :  { %v73_v55 = vadd.f32 1e-05, %v69_v54 }
  0xb2   :  { %117 = vrsqrt.f32 %v73_v55 }
  0xb8   :  { %v116_v57 = vpop.eup %115 }
  0xb9   :  { %v76_v58 = vmul.f32 %v116_v57, %v70_v56 }
  0xbb   :  { %v78_v59 = vmul.f32 %v76_v58, %v76_v58 }
  0xbc   :  { %v118_v61 = vpop.eup %117 }
  0xbd   :  { %v80_v62 = vsub.f32 0.0, %v78_v59  ;;  %v77_v63 = vmul.f32 %v118_v61, %v71_v60 }
  0xbf   :  { %v82_v2 = vmul.f32 1.442695, %v80_v62  ;;  %v79_v6 = vmul.f32 %v77_v63, %v77_v63 }
  0xc1   :  { %119 = vpow2.f32 %v82_v2  ;;  %v81_v7 = vsub.f32 0.0, %v79_v6 }
  0xc3   :  { %v84_v10 = vmul.f32 1.442695, %v81_v7 }
  0xc5   :  { %121 = vpow2.f32 %v84_v10 }
  0xcb   :  { %v120_v11 = vpop.eup %119 }
  0xcc   :  { %v94_v13 = vrot.slane %v120_v11, %v93_v12 }
  0xce   :  { %v104_v14 = vmul.f32 %v94_v13, %v137_v0 }
  0xcf   :  { %v122_v15 = vpop.eup %121 }
  0xd0   :  { %106 = vst [vmem:[%s167_s1] sm:$0xff] %v104_v14  ;;  %v101_v16 = vrot.slane %v122_v15, %v93_v12 }
  0xd2   :  { %v105_v17 = vmul.f32 %v101_v16, %v142_v1 }
  0xd4   :  { %107 = vst [vmem:[%s167_s1 + $0x8] sm:$0xff] %v105_v17 }

</bundles_post_ra>
